<compile_context>
chip_gen: v7x
topology: tpu7x:2x2x1
jax: 0.10.0
libtpu: 0.0.40
codegen_flags: <defaults>
</compile_context>

<pallas_src>
import jax
import jax.numpy as jnp
from jax.experimental import pallas as pl
from jax.experimental.pallas import tpu as pltpu


def _linear_kernel(x_ref, w_ref, b_ref, o_ref):
    # x_ref: (TB, D) f32 VMEM (batch tile)
    # w_ref: (1, D)  f32 VMEM (resident across all grid steps)
    # b_ref: (1,)    f32 SMEM (scalar bias)
    # o_ref: (TB, 1) f32 VMEM
    x = x_ref[...]
    w = w_ref[...]                                   # (1, D) -> broadcast over sublanes
    # VPU multiply + cross-lane reduction; keeps the MXU idle and avoids a
    # per-grid-step (1, D) transpose/relayout.
    y = jnp.sum(x * w, axis=-1, keepdims=True)       # (TB, 1) f32
    o_ref[...] = y + b_ref[0]


def linear_regression_forward(x, weight, bias, *, block_rows=512):
    """Pallas-backed equivalent of LinearRegressionModel.forward.

    x:      (B, D) float32
    weight: (1, D) float32   (nn.Linear(input_size, 1).weight)
    bias:   (1,)   float32   (nn.Linear(input_size, 1).bias)
    returns (B,)   float32   (output.reshape(-1))
    """
    B, D = x.shape
    x = x.astype(jnp.float32)
    weight = weight.astype(jnp.float32)
    bias = bias.reshape(1).astype(jnp.float32)

    # Batch tile: full batch if small, else 512-row tiles (well under scoped
    # VMEM even with double-buffering on v5e's 16 MiB / v7x's 32 MiB defaults
    # for moderate D). Partial trailing tiles are handled by Pallas padding.
    TB = B if B <= block_rows else block_rows
    grid = (pl.cdiv(B, TB),)

    out = pl.pallas_call(
        _linear_kernel,
        out_shape=jax.ShapeDtypeStruct((B, 1), jnp.float32),
        grid=grid,
        in_specs=[
            pl.BlockSpec((TB, D), lambda i: (i, 0)),        # batch-tiled x
            pl.BlockSpec((1, D), lambda i: (0, 0)),         # weight, resident
            pl.BlockSpec(memory_space=pltpu.SMEM),          # bias scalar in SMEM
        ],
        out_specs=pl.BlockSpec((TB, 1), lambda i: (i, 0)),
        compiler_params=pltpu.CompilerParams(
            dimension_semantics=("parallel",),
        ),
        cost_estimate=pl.CostEstimate(
            flops=2 * B * D,
            bytes_accessed=(B * D + D + 1 + B) * 4,
            transcendentals=0,
        ),
    )(x, weight, bias)
    # TODO(synk): output last-dim is 1 (masked vst); lane-dense (G, TB) output
    # layout is possible but negligible here since output << input HBM traffic.
    return out.reshape(-1)


if __name__ == "__main__":
    input_size = 8
    batch = 8

    key = jax.random.PRNGKey(0)
    kx, kw, kb, kx2 = jax.random.split(key, 4)

    # Deterministic parameter init mimicking nn.Linear's uniform(-1/sqrt(D), 1/sqrt(D))
    bound = 1.0 / jnp.sqrt(jnp.float32(input_size))
    weight = jax.random.uniform(kw, (1, input_size), jnp.float32, -bound, bound)
    bias = jax.random.uniform(kb, (1,), jnp.float32, -bound, bound)

    # Case 1: small batch (single tile).
    x = jax.random.normal(kx, (batch, input_size), jnp.float32)
    out = linear_regression_forward(x, weight, bias)
    jax.block_until_ready(out)
    ref = (x @ weight.T + bias).reshape(-1)
    assert out.shape == (batch,)
    assert jnp.allclose(out, ref, atol=1e-5), "mismatch vs reference (case 1)"

    # Case 2: multi-tile path with a partial trailing tile (exercises pipelining).
    B2 = 300
    x2 = jax.random.normal(kx2, (B2, input_size), jnp.float32)
    out2 = linear_regression_forward(x2, weight, bias, block_rows=128)
    jax.block_until_ready(out2)
    ref2 = (x2 @ weight.T + bias).reshape(-1)
    assert out2.shape == (B2,)
    assert jnp.allclose(out2, ref2, atol=1e-5), "mismatch vs reference (case 2)"

    print("KERNEL_OK")
</pallas_src>

<mosaic_0001>
module attributes {stable_mosaic.version = 11 : i64} {
  func.func @_linear_kernel(%arg0: i32, %arg1: memref<8x8xf32, #tpu.memory_space<vmem>>, %arg2: memref<1x8xf32, #tpu.memory_space<vmem>>, %arg3: memref<1xf32, #tpu.memory_space<smem>>, %arg4: memref<8x1xf32, #tpu.memory_space<vmem>>) attributes {dimension_semantics = [#tpu.dimension_semantics<parallel>], iteration_bounds = array<i64: 1>, scalar_prefetch = 0 : i64, scratch_operands = 0 : i64, tpu.core_type = #tpu.core_type<tc>, window_params = [{transform_indices = @transform_0, window_bounds = array<i64: 8, 8>}, {pipeline_mode = #tpu.pipeline_mode<synchronous>, transform_indices = @transform_1, window_bounds = array<i64: 1, 8>}, {transform_indices = @transform_2, window_bounds = array<i64: 1>}, {transform_indices = @transform_3, window_bounds = array<i64: 8, 1>}]} {
    %c0 = arith.constant 0 : index
    %c0_0 = arith.constant 0 : index
    %0 = vector.load %arg1[%c0, %c0_0] : memref<8x8xf32, #tpu.memory_space<vmem>>, vector<8x8xf32>
    %c0_1 = arith.constant 0 : index
    %c0_2 = arith.constant 0 : index
    %1 = vector.load %arg2[%c0_1, %c0_2] : memref<1x8xf32, #tpu.memory_space<vmem>>, vector<1x8xf32>
    %2 = vector.broadcast %1 : vector<1x8xf32> to vector<8x8xf32>
    %3 = arith.mulf %0, %2 : vector<8x8xf32>
    %cst = arith.constant dense<0.000000e+00> : vector<8xf32>
    %4 = vector.multi_reduction <add>, %3, %cst [1] : vector<8x8xf32> to vector<8xf32>
    %5 = vector.shape_cast %4 : vector<8xf32> to vector<8x1xf32>
    %c0_3 = arith.constant 0 : index
    %6 = memref.load %arg3[%c0_3] : memref<1xf32, #tpu.memory_space<smem>>
    %7 = vector.broadcast %6 : f32 to vector<8x1xf32>
    %8 = arith.addf %5, %7 : vector<8x1xf32>
    %c0_4 = arith.constant 0 : index
    %c0_5 = arith.constant 0 : index
    %9 = vector.load %arg4[%c0_4, %c0_5] : memref<8x1xf32, #tpu.memory_space<vmem>>, vector<8x1xf32>
    tpu.vector_store %arg4[%c0_4, %c0_5], %8 {strides = array<i32>} : memref<8x1xf32, #tpu.memory_space<vmem>>, vector<8x1xf32>,
    return
  }
  func.func @transform_0(%arg0: i32) -> (i32, i32) {
    %c0_i32 = arith.constant 0 : i32
    %c0_i32_0 = arith.constant 0 : i32
    return %arg0, %c0_i32 : i32, i32
  }
  func.func @transform_1(%arg0: i32) -> (i32, i32) {
    %c0_i32 = arith.constant 0 : i32
    %c0_i32_0 = arith.constant 0 : i32
    %c0_i32_1 = arith.constant 0 : i32
    return %c0_i32, %c0_i32_0 : i32, i32
  }
  func.func @transform_2(%arg0: i32) -> i32 {
    %c0_i32 = arith.constant 0 : i32
    %c0_i32_0 = arith.constant 0 : i32
    return %c0_i32 : i32
  }
  func.func @transform_3(%arg0: i32) -> (i32, i32) {
    %c0_i32 = arith.constant 0 : i32
    %c0_i32_0 = arith.constant 0 : i32
    return %arg0, %c0_i32 : i32, i32
  }
}

</mosaic_0001>

<bundles_post_ra>
// kernel: tpu_custom_call.1
= control target key start
LH: loop header
LB: loop body
LE: loop exit
PB: predicated region body
PF: predicated region fallthrough
CT: control target
= control target key end

     0   :  { %9 = vsyncpa [#allocation4], 0  ;;  %s76_s12 = smov [#allocation3]   ;;  %s118_s0 = inlined_call_operand.hbm [shape: f32[8,8], index: 0, kind: input, shape index: {}]   ;;  %s119_s1 = inlined_call_operand.vmem [shape: f32[1,8], index: 1, kind: input, shape index: {}]   ;;  %s120_s2 = inlined_call_operand.<no memory space> [shape: f32[1], index: 2, kind: input, shape index: {}]   ;;  %s121_s3 = inlined_call_operand.vmem [shape: f32[8,1], index: 3, kind: output, shape index: {}]  }
   0x1   :  { %s16_s13 = sshll.u32 %s76_s12, 4  ;;  %s52_s16 = scalar_lea.hbm %s118_s0, 128  ;;  %s17_s13 = int_to_ptr.vmem [resolvable:$true] %s16_s13 }
   0x2   :  { %p53_p0 = scmp.ne.s32.totalorder %s118_s0, %s52_s16  ;;  %p56_p1 = scmp.lt.u32.totalorder %s52_s16, %s118_s0 }
   0x4   :  { %p58_p2 = pnand %p56_p1, %p53_p0 }
   0x6   :  { %61 = shalt.err (!%p58_p2)
}
   0x7   :  { %s62_s21 = scalar_lea.vmem %s17_s13, 128  ;;  %p67_p4 = scmp.lt.s32.totalorder %s17_s13, %s17_s13 }
   0x8   :  { %p63_p3 = scmp.ne.s32.totalorder %s17_s13, %s62_s21  ;;  %p68_p5 = scmp.lt.s32.totalorder %s62_s21, %s62_s21 }
   0xa   :  { %p69_p6 = por %p68_p5, %p67_p4 }
   0xc   :  { %p70_p7 = pnand %p69_p6, %p63_p3 }
   0xe   :  { %73 = shalt.err (!%p70_p7)
}
   0xf   :  { %19 = dma.hbm_to_vmem [thread:$0]  %s118_s0, 128, %s17_s13, [#allocation4]  }
  0x10   :  { %74 = dma.done.wait [#allocation4], 128  }
  0x11   :  { %75 = vsyncadd [#allocation4], 4294967168  ;;  %v27_v0 = vld [vmem:[#allocation3] sm:$0xff]  ;;  %vm36_vm0 = vcmask 64512   ;;  %v41_v4 = vstv %s120_s2  ;;  %vm43_vm1 = vcmask 7168  }
  0x12   :  { %v50_v1 = vld [vmem:[%s119_s1] ss:$0 sm:$0xff] }
  0x13   :  { %v35_v2 = vmul.f32 %v50_v1, %v27_v0 }
  0x15   :  { %v37_v3 = vsel %vm36_vm0, %v35_v2, 0.0 }
  0x16   :  { %38 = vadd.xlane.f32.xlu0 %v37_v3 }
  0xa3   :  { %v39_v5 = vpop.xlane.xlu0 %38 }
  0xa4   :  { %v42_v6 = vadd.f32 %v41_v4, %v39_v5 }
  0xa6   :  { %44 = vst.msk [vmem:[%s121_s3] sm:$0xff] %vm43_vm1, %v42_v6 }
  0xa7   :  { %49 = vsyncpa [#allocation4], 1 }

</bundles_post_ra>
